<compile_context>
chip_gen: v7x
topology: tpu7x:2x2x1
jax: 0.10.0
libtpu: 0.0.40
codegen_flags: <defaults>
</compile_context>

<pallas_src>
import functools

import jax
import jax.numpy as jnp
from jax.experimental import pallas as pl
from jax.experimental.pallas import tpu as pltpu


def _round_up(a, m):
    return (a + m - 1) // m * m


def _tpu_vmem_capacity_bytes():
    try:
        return int(pltpu.get_tpu_info().vmem_capacity_bytes)
    except Exception:
        return 128 * 1024 * 1024   # v5e/v6e default if the query is unavailable


_VMEM_CAP_BYTES = _tpu_vmem_capacity_bytes()
# ~3/4 of physical VMEM: ≈48 MiB on v7x (64 MiB/TC), ≈96 MiB on v5e/v6e (128 MiB).
_VMEM_LIMIT_BYTES = int(max(32 * 1024 * 1024,
                            min((_VMEM_CAP_BYTES * 3) // 4, 100 * 1024 * 1024)))


def _fused_dft_bases(N, f_pad, dtype):
    """Fused real-DFT bases.  Contraction dims stay at the true N (no HBM padding);
    only the frequency axis is padded to a lane multiple (f_pad) for VMEM layout.

    Forward:  y = x @ Bf;  re = y[:, :f_pad], im = y[:, f_pad:2*f_pad]
    Inverse:  x_rec = re @ Bi[:f_pad] + im @ Bi[f_pad:]
    """
    F = N // 2 + 1
    n = jnp.arange(N, dtype=jnp.float32)[:, None]              # [N, 1]
    k = jnp.arange(F, dtype=jnp.float32)[None, :]              # [1, F]
    ang = 2.0 * jnp.pi * n * k / N                             # [N, F]
    cos_f = jnp.cos(ang)
    sin_f = -jnp.sin(ang)

    kk = jnp.arange(F)
    if N % 2 == 0:
        is_edge = (kk == 0) | (kk == N // 2)
    else:
        is_edge = kk == 0
    w = jnp.where(is_edge, 1.0, 2.0).astype(jnp.float32)       # [F]
    cos_i = (w[:, None] / N) * jnp.cos(ang.T)                  # [F, N]
    sin_i = -(w[:, None] / N) * jnp.sin(ang.T)                 # [F, N]

    bf = jnp.zeros((N, 2 * f_pad), jnp.float32)
    bf = bf.at[:, :F].set(cos_f).at[:, f_pad:f_pad + F].set(sin_f)
    bi = jnp.zeros((2 * f_pad, N), jnp.float32)
    bi = bi.at[:F, :].set(cos_i).at[f_pad:f_pad + F, :].set(sin_i)
    return bf.astype(dtype), bi.astype(dtype)


def _pick_tile_rows(R, N, f_pad, compute_dtype):
    """Static row-tile sizes: tr1 (pass 1, top-k) and tr2 (pass 2, decomposition)."""
    cs = jnp.dtype(compute_dtype).itemsize
    slack = 4 * 1024 * 1024
    bf_bytes = N * 2 * f_pad * cs
    bi_bytes = 2 * f_pad * N * cs

    # Pass 2: streams x + season + trend (double-buffered) + spectrum temps per row.
    per_row2 = 32 * N + 32 * f_pad + 4 * N * cs + 2 * f_pad * cs
    budget2 = max(2 * 1024 * 1024,
                  _VMEM_LIMIT_BYTES - 2 * (bf_bytes + bi_bytes) - slack)
    tr2 = int(max(8, min(1024, (budget2 // per_row2) // 8 * 8)))
    # Keep >= 2 row tiles whenever possible (megacore sharding on v7x).
    two_tile_cap = max(8, (_round_up(R, 8) // 2) // 8 * 8)
    tr2 = min(tr2, two_tile_cap)

    # Pass 1: streams only x plus a [tr,1] output -> larger tile, kept a multiple of tr2.
    per_row1 = 16 * N + 24 * f_pad + 2 * N * cs + 16
    budget1 = max(2 * 1024 * 1024, _VMEM_LIMIT_BYTES - 2 * bf_bytes - slack)
    tr1 = int(max(8, min(4096, budget1 // per_row1)))
    tr1 = max(tr2, (tr1 // tr2) * tr2)
    two_tile_cap1 = max(tr2, (_round_up(R, tr2) // 2) // tr2 * tr2)
    tr1 = min(tr1, two_tile_cap1)
    return tr1, tr2


def _kth_kernel(x_ref, bf_ref, kth_ref, *, rows_b0, n_rows, n_freq, f_pad,
                top_k, tile_rows, compute_dtype):
    """Pass 1: per-row k-th largest squared frequency magnitude (with multiplicity)."""
    x = x_ref[...]                                                       # [TR, N] f32
    y = jnp.dot(x.astype(compute_dtype), bf_ref[...],
                preferred_element_type=jnp.float32)                      # [TR, 2*F_pad]
    re = y[:, :f_pad]
    im = y[:, f_pad:]
    mag2 = re * re + im * im                                             # |xf|^2 (no sqrt)

    row0 = pl.program_id(0) * tile_rows
    row = row0 + jax.lax.broadcasted_iota(jnp.int32, mag2.shape, 0)
    mag2 = jnp.where(row < rows_b0, 0.0, mag2)                           # freq[0] = 0 (batch 0)

    col = jax.lax.broadcasted_iota(jnp.int32, mag2.shape, 1)
    work = jnp.where(col < n_freq, mag2, -jnp.inf)                       # exclude padded lanes
    kth = None
    for _ in range(top_k):                                               # exact top-k w/ ties
        kth = jnp.max(work, axis=-1, keepdims=True)                      # [TR, 1]
        first = jnp.min(jnp.where(work == kth, col, f_pad),
                        axis=-1, keepdims=True)                          # first occurrence
        work = jnp.where(col == first, -jnp.inf, work)

    rowk = row0 + jax.lax.broadcasted_iota(jnp.int32, kth.shape, 0)
    kth_ref[...] = jnp.where(rowk < n_rows, kth, jnp.inf)                # padded rows ignored


def _decomp_kernel(thr_ref, x_ref, bf_ref, bi_ref, season_ref, trend_ref, *,
                   rows_b0, f_pad, tile_rows, compute_dtype):
    """Pass 2: mask spectrum against the global (squared) threshold and invert."""
    x = x_ref[...]                                                       # [TR, N] f32
    y = jnp.dot(x.astype(compute_dtype), bf_ref[...],
                preferred_element_type=jnp.float32)                      # [TR, 2*F_pad]
    re = y[:, :f_pad]
    im = y[:, f_pad:]
    mag2 = re * re + im * im

    row = pl.program_id(0) * tile_rows + jax.lax.broadcasted_iota(
        jnp.int32, mag2.shape, 0)
    keep = jnp.logical_and(row >= rows_b0, mag2 > thr_ref[0])            # freq[0]=0 & freq>thr

    # No concatenation: mask the halves in place and contract against the two
    # 128-aligned halves of the resident inverse basis (same MXU work, less VMEM).
    zre = jnp.where(keep, re, 0.0).astype(compute_dtype)
    zim = jnp.where(keep, im, 0.0).astype(compute_dtype)
    season = jnp.dot(zre, bi_ref[0:f_pad, :], preferred_element_type=jnp.float32)
    season = season + jnp.dot(zim, bi_ref[f_pad:2 * f_pad, :],
                              preferred_element_type=jnp.float32)        # [TR, N]
    season_ref[...] = season
    trend_ref[...] = x - season                                          # direct, no temp


@functools.partial(jax.jit, static_argnames=("top_k", "compute_dtype"))
def dft_series_decomp(x, top_k=5, compute_dtype=jnp.bfloat16):
    """x: [B, T, N] float32 -> (x_season, x_trend), each [B, T, N]."""
    B, T, N = x.shape
    F = N // 2 + 1
    if F < top_k:
        raise ValueError(f"rfft length {F} < top_k {top_k}")
    R = B * T
    f_pad = _round_up(F, 128)                       # VMEM-only lane padding of the spectrum

    tr1, tr2 = _pick_tile_rows(R, N, f_pad, compute_dtype)
    r_pad = _round_up(R, tr1)                       # tr1 is a multiple of tr2
    padded = r_pad > R

    x2 = x.reshape(R, N).astype(jnp.float32)
    if padded:
        x2 = jnp.pad(x2, ((0, r_pad - R), (0, 0)))  # row padding only; feature dim unpadded

    bf, bi = _fused_dft_bases(N, f_pad, compute_dtype)

    cparams = pltpu.CompilerParams(
        dimension_semantics=("parallel",),          # shard row tiles across TCs (v7x)
        vmem_limit_bytes=_VMEM_LIMIT_BYTES)

    # ---- pass 1: per-row kth-largest |xf|^2 --------------------------------------------
    kth_kernel = functools.partial(
        _kth_kernel, rows_b0=T, n_rows=R, n_freq=F, f_pad=f_pad,
        top_k=top_k, tile_rows=tr1, compute_dtype=compute_dtype)
    kth = pl.pallas_call(
        kth_kernel,
        out_shape=jax.ShapeDtypeStruct((r_pad, 1), jnp.float32),
        grid_spec=pl.GridSpec(
            grid=(r_pad // tr1,),
            in_specs=[
                pl.BlockSpec((tr1, N), lambda i: (i, 0)),
                pl.BlockSpec((N, 2 * f_pad), lambda i: (0, 0)),
            ],
            out_specs=pl.BlockSpec((tr1, 1), lambda i: (i, 0)),
        ),
        compiler_params=cparams,
    )(x2, bf)

    # Global threshold (squared magnitudes): tiny cross-tile reduction done by XLA.
    thr = jnp.min(kth).reshape(1)

    # ---- pass 2: mask spectrum, fused inverse DFT, trend = x - season -------------------
    decomp_kernel = functools.partial(
        _decomp_kernel, rows_b0=T, f_pad=f_pad, tile_rows=tr2,
        compute_dtype=compute_dtype)
    # Alias the (fresh, padded) x buffer onto the trend output to drop one HBM allocation.
    aliases = {1: 1} if padded else {}
    season2, trend2 = pl.pallas_call(
        decomp_kernel,
        out_shape=(jax.ShapeDtypeStruct((r_pad, N), jnp.float32),
                   jax.ShapeDtypeStruct((r_pad, N), jnp.float32)),
        grid_spec=pl.GridSpec(
            grid=(r_pad // tr2,),
            in_specs=[
                pl.BlockSpec(memory_space=pltpu.MemorySpace.SMEM),    # thr scalar
                pl.BlockSpec((tr2, N), lambda i: (i, 0)),
                pl.BlockSpec((N, 2 * f_pad), lambda i: (0, 0)),
                pl.BlockSpec((2 * f_pad, N), lambda i: (0, 0)),
            ],
            out_specs=[
                pl.BlockSpec((tr2, N), lambda i: (i, 0)),
                pl.BlockSpec((tr2, N), lambda i: (i, 0)),
            ],
        ),
        compiler_params=cparams,
        input_output_aliases=aliases,
    )(thr, x2, bf, bi)

    if padded:
        season2 = season2[:R]
        trend2 = trend2[:R]
    return season2.reshape(B, T, N), trend2.reshape(B, T, N)


def _reference(x, top_k=5):
    # Pure-JAX reference mirroring the PyTorch module (torch code hardcodes k=5).
    xf = jnp.fft.rfft(x, axis=-1)
    freq = jnp.abs(xf)
    freq = freq.at[0].set(0.0)
    thr = jax.lax.top_k(freq, top_k)[0].min()
    xf = jnp.where(freq <= thr, 0.0 + 0.0j, xf)
    season = jnp.fft.irfft(xf, n=x.shape[-1], axis=-1)
    trend = x - season
    return season.astype(x.dtype), trend.astype(x.dtype)


if __name__ == "__main__":
    key = jax.random.PRNGKey(0)
    B, T, N = 2, 8, 32          # batch=2, seq=8, feature (FFT) dim=32
    x = jax.random.normal(key, (B, T, N), dtype=jnp.float32)

    season_ref, trend_ref = _reference(x, top_k=5)

    # f32-MXU path: bit-tight agreement with the FFT reference.
    season32, trend32 = dft_series_decomp(x, top_k=5, compute_dtype=jnp.float32)
    jax.block_until_ready((season32, trend32))
    assert season32.shape == (B, T, N) and trend32.shape == (B, T, N)
    assert jnp.allclose(season32, season_ref, atol=1e-3, rtol=1e-3)
    assert jnp.allclose(trend32, trend_ref, atol=1e-3, rtol=1e-3)
    assert jnp.allclose(season32 + trend32, x, atol=1e-5)

    # Default bf16-MXU path (fast path on v6e/v7x): f32 accumulation, looser tolerance
    # covering the bf16 DFT round-trip error.
    season, trend = dft_series_decomp(x, top_k=5)
    jax.block_until_ready((season, trend))
    assert season.shape == (B, T, N) and trend.shape == (B, T, N)
    assert jnp.allclose(season + trend, x, atol=1e-5)
    assert jnp.allclose(season, season_ref, atol=7.5e-2, rtol=7.5e-2)
    assert jnp.allclose(trend, trend_ref, atol=7.5e-2, rtol=7.5e-2)
    rel = (jnp.linalg.norm(season - season_ref) /
           (jnp.linalg.norm(season_ref) + 1e-12))
    assert rel < 3e-2

    print("KERNEL_OK")
</pallas_src>

<mosaic_0001>
module attributes {stable_mosaic.version = 11 : i64} {
  func.func @_kth_kernel(%arg0: i32, %arg1: memref<8x32xf32, #tpu.memory_space<vmem>>, %arg2: memref<32x256xf32, #tpu.memory_space<vmem>>, %arg3: memref<8x1xf32, #tpu.memory_space<vmem>>) attributes {dimension_semantics = [#tpu.dimension_semantics<parallel>], iteration_bounds = array<i64: 2>, scalar_prefetch = 0 : i64, scratch_operands = 0 : i64, tpu.core_type = #tpu.core_type<tc>, window_params = [{transform_indices = @transform_0, window_bounds = array<i64: 8, 32>}, {pipeline_mode = #tpu.pipeline_mode<synchronous>, transform_indices = @transform_1, window_bounds = array<i64: 32, 256>}, {transform_indices = @transform_2, window_bounds = array<i64: 8, 1>}]} {
    %c0 = arith.constant 0 : index
    %c0_0 = arith.constant 0 : index
    %0 = vector.load %arg1[%c0, %c0_0] : memref<8x32xf32, #tpu.memory_space<vmem>>, vector<8x32xf32>
    %c0_1 = arith.constant 0 : index
    %c0_2 = arith.constant 0 : index
    %1 = vector.load %arg2[%c0_1, %c0_2] : memref<32x256xf32, #tpu.memory_space<vmem>>, vector<32x256xf32>
    %cst = arith.constant dense<0.000000e+00> : vector<8x256xf32>
    %2 = tpu.matmul %0, %1, %cst {dimension_numbers = #tpu.dot_dimension_numbers<[1], [0], [0], [1], [0, 0, 1, 1], [], []>} : vector<8x32xf32>, vector<32x256xf32>, vector<8x256xf32> -> vector<8x256xf32>
    %3 = vector.extract_strided_slice %2 {offsets = [0, 0], sizes = [8, 128], strides = [1, 1]} : vector<8x256xf32> to vector<8x128xf32>
    %4 = vector.extract_strided_slice %2 {offsets = [0, 128], sizes = [8, 128], strides = [1, 1]} : vector<8x256xf32> to vector<8x128xf32>
    %5 = arith.mulf %3, %3 : vector<8x128xf32>
    %6 = arith.mulf %4, %4 : vector<8x128xf32>
    %7 = arith.addf %5, %6 : vector<8x128xf32>
    %c8_i32 = arith.constant 8 : i32
    %8 = arith.muli %arg0, %c8_i32 : i32
    %9 = tpu.iota {dimensions = array<i32: 0>} : vector<8x128xi32>
    %10 = vector.broadcast %8 : i32 to vector<8x128xi32>
    %11 = arith.addi %10, %9 : vector<8x128xi32>
    %c8_i32_3 = arith.constant 8 : i32
    %12 = vector.broadcast %c8_i32_3 : i32 to vector<8x128xi32>
    %13 = arith.cmpi slt, %11, %12 : vector<8x128xi32>
    %cst_4 = arith.constant 0.000000e+00 : f32
    %14 = vector.broadcast %cst_4 : f32 to vector<8x128xf32>
    %15 = arith.select %13, %14, %7 : vector<8x128xi1>, vector<8x128xf32>
    %16 = tpu.iota {dimensions = array<i32: 1>} : vector<8x128xi32>
    %c17_i32 = arith.constant 17 : i32
    %17 = vector.broadcast %c17_i32 : i32 to vector<8x128xi32>
    %18 = arith.cmpi slt, %16, %17 : vector<8x128xi32>
    %cst_5 = arith.constant 0xFF800000 : f32
    %19 = vector.broadcast %cst_5 : f32 to vector<8x128xf32>
    %20 = arith.select %18, %15, %19 : vector<8x128xi1>, vector<8x128xf32>
    %cst_6 = arith.constant dense<0xFF800000> : vector<8xf32>
    %21 = vector.multi_reduction <maximumf>, %20, %cst_6 [1] : vector<8x128xf32> to vector<8xf32>
    %22 = vector.shape_cast %21 : vector<8xf32> to vector<8x1xf32>
    %23 = vector.broadcast %22 : vector<8x1xf32> to vector<8x128xf32>
    %24 = arith.cmpf oeq, %20, %23 : vector<8x128xf32>
    %c128_i32 = arith.constant 128 : i32
    %25 = vector.broadcast %c128_i32 : i32 to vector<8x128xi32>
    %26 = arith.select %24, %16, %25 : vector<8x128xi1>, vector<8x128xi32>
    %cst_7 = arith.constant dense<2147483647> : vector<8xi32>
    %27 = vector.multi_reduction <minsi>, %26, %cst_7 [1] : vector<8x128xi32> to vector<8xi32>
    %28 = vector.shape_cast %27 : vector<8xi32> to vector<8x1xi32>
    %29 = vector.broadcast %28 : vector<8x1xi32> to vector<8x128xi32>
    %30 = arith.cmpi eq, %16, %29 : vector<8x128xi32>
    %cst_8 = arith.constant 0xFF800000 : f32
    %31 = vector.broadcast %cst_8 : f32 to vector<8x128xf32>
    %32 = arith.select %30, %31, %20 : vector<8x128xi1>, vector<8x128xf32>
    %cst_9 = arith.constant dense<0xFF800000> : vector<8xf32>
    %33 = vector.multi_reduction <maximumf>, %32, %cst_9 [1] : vector<8x128xf32> to vector<8xf32>
    %34 = vector.shape_cast %33 : vector<8xf32> to vector<8x1xf32>
    %35 = vector.broadcast %34 : vector<8x1xf32> to vector<8x128xf32>
    %36 = arith.cmpf oeq, %32, %35 : vector<8x128xf32>
    %c128_i32_10 = arith.constant 128 : i32
    %37 = vector.broadcast %c128_i32_10 : i32 to vector<8x128xi32>
    %38 = arith.select %36, %16, %37 : vector<8x128xi1>, vector<8x128xi32>
    %cst_11 = arith.constant dense<2147483647> : vector<8xi32>
    %39 = vector.multi_reduction <minsi>, %38, %cst_11 [1] : vector<8x128xi32> to vector<8xi32>
    %40 = vector.shape_cast %39 : vector<8xi32> to vector<8x1xi32>
    %41 = vector.broadcast %40 : vector<8x1xi32> to vector<8x128xi32>
    %42 = arith.cmpi eq, %16, %41 : vector<8x128xi32>
    %cst_12 = arith.constant 0xFF800000 : f32
    %43 = vector.broadcast %cst_12 : f32 to vector<8x128xf32>
    %44 = arith.select %42, %43, %32 : vector<8x128xi1>, vector<8x128xf32>
    %cst_13 = arith.constant dense<0xFF800000> : vector<8xf32>
    %45 = vector.multi_reduction <maximumf>, %44, %cst_13 [1] : vector<8x128xf32> to vector<8xf32>
    %46 = vector.shape_cast %45 : vector<8xf32> to vector<8x1xf32>
    %47 = vector.broadcast %46 : vector<8x1xf32> to vector<8x128xf32>
    %48 = arith.cmpf oeq, %44, %47 : vector<8x128xf32>
    %c128_i32_14 = arith.constant 128 : i32
    %49 = vector.broadcast %c128_i32_14 : i32 to vector<8x128xi32>
    %50 = arith.select %48, %16, %49 : vector<8x128xi1>, vector<8x128xi32>
    %cst_15 = arith.constant dense<2147483647> : vector<8xi32>
    %51 = vector.multi_reduction <minsi>, %50, %cst_15 [1] : vector<8x128xi32> to vector<8xi32>
    %52 = vector.shape_cast %51 : vector<8xi32> to vector<8x1xi32>
    %53 = vector.broadcast %52 : vector<8x1xi32> to vector<8x128xi32>
    %54 = arith.cmpi eq, %16, %53 : vector<8x128xi32>
    %cst_16 = arith.constant 0xFF800000 : f32
    %55 = vector.broadcast %cst_16 : f32 to vector<8x128xf32>
    %56 = arith.select %54, %55, %44 : vector<8x128xi1>, vector<8x128xf32>
    %cst_17 = arith.constant dense<0xFF800000> : vector<8xf32>
    %57 = vector.multi_reduction <maximumf>, %56, %cst_17 [1] : vector<8x128xf32> to vector<8xf32>
    %58 = vector.shape_cast %57 : vector<8xf32> to vector<8x1xf32>
    %59 = vector.broadcast %58 : vector<8x1xf32> to vector<8x128xf32>
    %60 = arith.cmpf oeq, %56, %59 : vector<8x128xf32>
    %c128_i32_18 = arith.constant 128 : i32
    %61 = vector.broadcast %c128_i32_18 : i32 to vector<8x128xi32>
    %62 = arith.select %60, %16, %61 : vector<8x128xi1>, vector<8x128xi32>
    %cst_19 = arith.constant dense<2147483647> : vector<8xi32>
    %63 = vector.multi_reduction <minsi>, %62, %cst_19 [1] : vector<8x128xi32> to vector<8xi32>
    %64 = vector.shape_cast %63 : vector<8xi32> to vector<8x1xi32>
    %65 = vector.broadcast %64 : vector<8x1xi32> to vector<8x128xi32>
    %66 = arith.cmpi eq, %16, %65 : vector<8x128xi32>
    %cst_20 = arith.constant 0xFF800000 : f32
    %67 = vector.broadcast %cst_20 : f32 to vector<8x128xf32>
    %68 = arith.select %66, %67, %56 : vector<8x128xi1>, vector<8x128xf32>
    %cst_21 = arith.constant dense<0xFF800000> : vector<8xf32>
    %69 = vector.multi_reduction <maximumf>, %68, %cst_21 [1] : vector<8x128xf32> to vector<8xf32>
    %70 = vector.shape_cast %69 : vector<8xf32> to vector<8x1xf32>
    %71 = tpu.iota {dimensions = array<i32: 0>} : vector<8x1xi32>
    %72 = vector.broadcast %8 : i32 to vector<8x1xi32>
    %73 = arith.addi %72, %71 : vector<8x1xi32>
    %c16_i32 = arith.constant 16 : i32
    %74 = vector.broadcast %c16_i32 : i32 to vector<8x1xi32>
    %75 = arith.cmpi slt, %73, %74 : vector<8x1xi32>
    %cst_22 = arith.constant 0x7F800000 : f32
    %76 = vector.broadcast %cst_22 : f32 to vector<8x1xf32>
    %77 = arith.select %75, %70, %76 : vector<8x1xi1>, vector<8x1xf32>
    %c0_23 = arith.constant 0 : index
    %c0_24 = arith.constant 0 : index
    %78 = vector.load %arg3[%c0_23, %c0_24] : memref<8x1xf32, #tpu.memory_space<vmem>>, vector<8x1xf32>
    tpu.vector_store %arg3[%c0_23, %c0_24], %77 {strides = array<i32>} : memref<8x1xf32, #tpu.memory_space<vmem>>, vector<8x1xf32>,
    return
  }
  func.func @transform_0(%arg0: i32) -> (i32, i32) {
    %c0_i32 = arith.constant 0 : i32
    %c0_i32_0 = arith.constant 0 : i32
    return %arg0, %c0_i32 : i32, i32
  }
  func.func @transform_1(%arg0: i32) -> (i32, i32) {
    %c0_i32 = arith.constant 0 : i32
    %c0_i32_0 = arith.constant 0 : i32
    %c0_i32_1 = arith.constant 0 : i32
    return %c0_i32, %c0_i32_0 : i32, i32
  }
  func.func @transform_2(%arg0: i32) -> (i32, i32) {
    %c0_i32 = arith.constant 0 : i32
    %c0_i32_0 = arith.constant 0 : i32
    return %arg0, %c0_i32 : i32, i32
  }
}

module attributes {stable_mosaic.version = 11 : i64} {
  func.func @_decomp_kernel(%arg0: i32, %arg1: memref<1xf32, #tpu.memory_space<smem>>, %arg2: memref<8x32xf32, #tpu.memory_space<vmem>>, %arg3: memref<32x256xf32, #tpu.memory_space<vmem>>, %arg4: memref<256x32xf32, #tpu.memory_space<vmem>>, %arg5: memref<8x32xf32, #tpu.memory_space<vmem>>, %arg6: memref<8x32xf32, #tpu.memory_space<vmem>>) attributes {dimension_semantics = [#tpu.dimension_semantics<parallel>], iteration_bounds = array<i64: 2>, scalar_prefetch = 0 : i64, scratch_operands = 0 : i64, tpu.core_type = #tpu.core_type<tc>, window_params = [{transform_indices = @transform_0, window_bounds = array<i64: 1>}, {transform_indices = @transform_1, window_bounds = array<i64: 8, 32>}, {pipeline_mode = #tpu.pipeline_mode<synchronous>, transform_indices = @transform_2, window_bounds = array<i64: 32, 256>}, {pipeline_mode = #tpu.pipeline_mode<synchronous>, transform_indices = @transform_3, window_bounds = array<i64: 256, 32>}, {transform_indices = @transform_4, window_bounds = array<i64: 8, 32>}, {transform_indices = @transform_5, window_bounds = array<i64: 8, 32>}]} {
    %c0 = arith.constant 0 : index
    %c0_0 = arith.constant 0 : index
    %0 = vector.load %arg2[%c0, %c0_0] : memref<8x32xf32, #tpu.memory_space<vmem>>, vector<8x32xf32>
    %c0_1 = arith.constant 0 : index
    %c0_2 = arith.constant 0 : index
    %1 = vector.load %arg3[%c0_1, %c0_2] : memref<32x256xf32, #tpu.memory_space<vmem>>, vector<32x256xf32>
    %cst = arith.constant dense<0.000000e+00> : vector<8x256xf32>
    %2 = tpu.matmul %0, %1, %cst {dimension_numbers = #tpu.dot_dimension_numbers<[1], [0], [0], [1], [0, 0, 1, 1], [], []>} : vector<8x32xf32>, vector<32x256xf32>, vector<8x256xf32> -> vector<8x256xf32>
    %3 = vector.extract_strided_slice %2 {offsets = [0, 0], sizes = [8, 128], strides = [1, 1]} : vector<8x256xf32> to vector<8x128xf32>
    %4 = vector.extract_strided_slice %2 {offsets = [0, 128], sizes = [8, 128], strides = [1, 1]} : vector<8x256xf32> to vector<8x128xf32>
    %5 = arith.mulf %3, %3 : vector<8x128xf32>
    %6 = arith.mulf %4, %4 : vector<8x128xf32>
    %7 = arith.addf %5, %6 : vector<8x128xf32>
    %c8_i32 = arith.constant 8 : i32
    %8 = arith.muli %arg0, %c8_i32 : i32
    %9 = tpu.iota {dimensions = array<i32: 0>} : vector<8x128xi32>
    %10 = vector.broadcast %8 : i32 to vector<8x128xi32>
    %11 = arith.addi %10, %9 : vector<8x128xi32>
    %c8_i32_3 = arith.constant 8 : i32
    %12 = vector.broadcast %c8_i32_3 : i32 to vector<8x128xi32>
    %13 = arith.cmpi sge, %11, %12 : vector<8x128xi32>
    %c0_4 = arith.constant 0 : index
    %14 = memref.load %arg1[%c0_4] : memref<1xf32, #tpu.memory_space<smem>>
    %15 = vector.broadcast %14 : f32 to vector<8x128xf32>
    %16 = arith.cmpf ogt, %7, %15 : vector<8x128xf32>
    %17 = arith.andi %13, %16 : vector<8x128xi1>
    %cst_5 = arith.constant 0.000000e+00 : f32
    %18 = vector.broadcast %cst_5 : f32 to vector<8x128xf32>
    %19 = arith.select %17, %3, %18 : vector<8x128xi1>, vector<8x128xf32>
    %cst_6 = arith.constant 0.000000e+00 : f32
    %20 = vector.broadcast %cst_6 : f32 to vector<8x128xf32>
    %21 = arith.select %17, %4, %20 : vector<8x128xi1>, vector<8x128xf32>
    %c0_7 = arith.constant 0 : index
    %c0_8 = arith.constant 0 : index
    %22 = vector.load %arg4[%c0_7, %c0_8] : memref<256x32xf32, #tpu.memory_space<vmem>>, vector<128x32xf32>
    %cst_9 = arith.constant dense<0.000000e+00> : vector<8x32xf32>
    %23 = tpu.matmul %19, %22, %cst_9 {dimension_numbers = #tpu.dot_dimension_numbers<[1], [0], [0], [1], [0, 0, 1, 1], [], []>} : vector<8x128xf32>, vector<128x32xf32>, vector<8x32xf32> -> vector<8x32xf32>
    %c128 = arith.constant 128 : index
    %c0_10 = arith.constant 0 : index
    %24 = vector.load %arg4[%c128, %c0_10] : memref<256x32xf32, #tpu.memory_space<vmem>>, vector<128x32xf32>
    %cst_11 = arith.constant dense<0.000000e+00> : vector<8x32xf32>
    %25 = tpu.matmul %21, %24, %cst_11 {dimension_numbers = #tpu.dot_dimension_numbers<[1], [0], [0], [1], [0, 0, 1, 1], [], []>} : vector<8x128xf32>, vector<128x32xf32>, vector<8x32xf32> -> vector<8x32xf32>
    %26 = arith.addf %23, %25 : vector<8x32xf32>
    %c0_12 = arith.constant 0 : index
    %c0_13 = arith.constant 0 : index
    %27 = vector.load %arg5[%c0_12, %c0_13] : memref<8x32xf32, #tpu.memory_space<vmem>>, vector<8x32xf32>
    tpu.vector_store %arg5[%c0_12, %c0_13], %26 {strides = array<i32>} : memref<8x32xf32, #tpu.memory_space<vmem>>, vector<8x32xf32>,
    %28 = arith.subf %0, %26 : vector<8x32xf32>
    %c0_14 = arith.constant 0 : index
    %c0_15 = arith.constant 0 : index
    %29 = vector.load %arg6[%c0_14, %c0_15] : memref<8x32xf32, #tpu.memory_space<vmem>>, vector<8x32xf32>
    tpu.vector_store %arg6[%c0_14, %c0_15], %28 {strides = array<i32>} : memref<8x32xf32, #tpu.memory_space<vmem>>, vector<8x32xf32>,
    return
  }
  func.func @transform_0(%arg0: i32) -> i32 {
    %c0_i32 = arith.constant 0 : i32
    %c0_i32_0 = arith.constant 0 : i32
    return %c0_i32 : i32
  }
  func.func @transform_1(%arg0: i32) -> (i32, i32) {
    %c0_i32 = arith.constant 0 : i32
    %c0_i32_0 = arith.constant 0 : i32
    return %arg0, %c0_i32 : i32, i32
  }
  func.func @transform_2(%arg0: i32) -> (i32, i32) {
    %c0_i32 = arith.constant 0 : i32
    %c0_i32_0 = arith.constant 0 : i32
    %c0_i32_1 = arith.constant 0 : i32
    return %c0_i32, %c0_i32_0 : i32, i32
  }
  func.func @transform_3(%arg0: i32) -> (i32, i32) {
    %c0_i32 = arith.constant 0 : i32
    %c0_i32_0 = arith.constant 0 : i32
    %c0_i32_1 = arith.constant 0 : i32
    return %c0_i32, %c0_i32_0 : i32, i32
  }
  func.func @transform_4(%arg0: i32) -> (i32, i32) {
    %c0_i32 = arith.constant 0 : i32
    %c0_i32_0 = arith.constant 0 : i32
    return %arg0, %c0_i32 : i32, i32
  }
  func.func @transform_5(%arg0: i32) -> (i32, i32) {
    %c0_i32 = arith.constant 0 : i32
    %c0_i32_0 = arith.constant 0 : i32
    return %arg0, %c0_i32 : i32, i32
  }
}

</mosaic_0001>

<bundles_post_ra>
// kernel: dft_series_decomp.2
= control target key start
LH: loop header
LB: loop body
LE: loop exit
PB: predicated region body
PF: predicated region fallthrough
CT: control target
= control target key end

     0   :  { %7 = vsyncpa [#allocation3], 0  ;;  %s903_s0 = inlined_call_operand.hbm [shape: f32[16,32], index: 0, kind: input, shape index: {}]   ;;  %s904_s1 = inlined_call_operand.hbm [shape: f32[32,256], index: 1, kind: input, shape index: {}]   ;;  %s905_s2 = inlined_call_operand.hbm [shape: f32[16,1], index: 2, kind: output, shape index: {}]  }
   0x1   :  { %9 = vsyncpa [#allocation3 + $0x1], 0 }
   0x2   :  { %10 = vsyncpa [#allocation6], 0 }
   0x3   :  { %11 = vsyncpa [#allocation4], 0 }
   0x4   :  { %13 = vsyncpa [#allocation4 + $0x1], 0  ;;  %s687_s9 = smov 0   ;;  %s689_s10 = smov 0  }
   0x5   :  { %s691_s11 = smov 0   ;;  %s693_s12 = smov 0  }
   0x6 LB: > { %s708_s13 = sadd.s32 4294967295, %s664_s12   ;;  %s452_s14 = sadd.s32 4294967294, %s664_s12   ;;  %s664_s12 = sphi %s693_s12, %s925_s12   ;;  %s660_s11 = sphi %s691_s11, %s924_s11   ;;  %s656_s10 = sphi %s689_s10, %s923_s10   ;;  %s652_s9 = sphi %s687_s9, %s922_s9  }
   0x7   : > { %p39_p0 = scmp.ne.s32.totalorder %s656_s10, %s652_s9  ;;  %p906_p1 = scmp.eq.s32.totalorder %s708_s13, 0 }
   0x8   : > { %p90_p3 = scmp.eq.s32.totalorder %s452_s14, 1  ;;  %p453_p5 = scmp.ge.s32.totalorder %s664_s12, 1 }
   0x9   : > { %p717_p4 = por %p906_p1, %p39_p0  ;;  %p97_p7 = scmp.lt.s32.totalorder %s664_s12, 3 }
   0xa   : > { %p722_p6 = por %p90_p3, %p39_p0  ;;  %s666_s18 = smov [#allocation5]  }
   0xb   : > { %s909_s15 = scalar_select %p717_p4, 1, 0 }
   0xc   : > { %s910_s16 = scalar_select %p722_p6, 1, 0 }
   0xd   : > { %p727_p8 = pnand %p453_p5, %p97_p7  ;;  %s109_s19 = sshll.u32 %s666_s18, 4  ;;  %s731_s19 = int_to_ptr.vmem [resolvable:$true] %s109_s19 }
   0xe   : > { %s743_s21 = sadd.s32 1, %s664_s12   ;;  %s26_s22 = sadd.s32 1, %s660_s11 }
   0xf   : > { %s911_s17 = scalar_select %p727_p8, 1, 0 }
  0x10   : > { %p484_p9 = pneg %p727_p8  ;;  %s23_s23 = ssub.s32 %s664_s12, %s743_s21 }
  0x11   : > { %s536_s26 = scalar_lea.hbm %s904_s1, 1024 }
  0x12   : > { %p738_p11 = pnand %p484_p9, %p906_p1  ;;  %p537_p12 = scmp.ne.s32.totalorder %s904_s1, %s536_s26 }
  0x13   : > { %p543_p5 = scmp.lt.u32.totalorder %s536_s26, %s904_s1 }
  0x14   : > { %p538_p13 = pneg %p738_p11 }
  0x16   : > { %p539_p0 = pnand %p538_p13, %p537_p12 }
  0x18   : > { %p540_p3 = pneg %p539_p0 }
  0x1a   : > { %p545_p7 = pnand %p543_p5, %p540_p3 }
  0x1c   : > { %548 = shalt.err (!%p545_p7)
}
  0x1d   : > { %s549_s3 = scalar_lea.vmem %s731_s19, 1024  ;;  %p557_p2 = scmp.lt.s32.totalorder %s731_s19, %s731_s19 }
  0x1e   : > { %p550_p9 = scmp.ne.s32.totalorder %s731_s19, %s549_s3  ;;  %p558_p6 = scmp.lt.s32.totalorder %s549_s3, %s549_s3 }
  0x20   : > { %p552_p10 = pnand %p550_p9, %p538_p13  ;;  %p559_p4 = por %p558_p6, %p557_p2 }
  0x22   : > { %p553_p1 = pneg %p552_p10 }
  0x24   : > { %p560_p8 = pnand %p559_p4, %p553_p1 }
  0x26   : > { %563 = shalt.err (!%p560_p8)
}
  0x27   : > { %s667_s4 = smov 256   ;;  %s668_s5 = smov 16  }
  0x28   : > { %487 = dma.hbm_to_vmem [thread:$0]  (!%p738_p11), %s904_s1, 1024, %s731_s19, [#allocation6], %s667_s4, %s667_s4, %s668_s5  }
  0x29   : > { %p24_p2 = scmp.eq.s32.totalorder %s23_s23, 0  ;;  %p33_p1 = scmp.ne.s32.totalorder %s660_s11, %s656_s10 }
  0x2a   : > { %p34_p4 = scmp.eq.s32.totalorder %s664_s12, 0  ;;  %p497_p6 = scmp.lt.s32.totalorder %s664_s12, 2 }
  0x2b   : > { %s774_s8 = scalar_select %p24_p2, %s660_s11, %s26_s22  }
  0x2c   : > { %p35_p8 = por %p34_p4, %p33_p1  ;;  %p913_p10 = scmp.eq.s32.totalorder %s708_s13, 1 }
  0x2d   : > { %s123_s18 = sand.u32 1, %s660_s11   ;;  %s457_s24 = sshll.u32 %s664_s12, 7 }
  0x2e   : > { %p778_p12 = por %p913_p10, %p33_p1  ;;  %s456_s25 = sshll.u32 %s123_s18, 3 }
  0x2f   : > { %s787_s27 = scalar_lea.hbm %s903_s0, %s457_s24  ;;  %s127_s19 = scalar_lea.vmem [#allocation2], %s456_s25 }
  0x30   : > { %s134_s22 = sshll.u32 %s127_s19, 4  ;;  %p789_p11 = pnand %p497_p6, %p35_p8  ;;  %s793_s22 = int_to_ptr.vmem [resolvable:$true] %s134_s22 }
  0x31   : > { %s124_s28 = scalar_lea.sflag [#allocation3], %s123_s18  ;;  %s564_s29 = scalar_lea.hbm %s787_s27, 128 }
  0x32   : > { %p565_p13 = scmp.ne.s32.totalorder %s787_s27, %s564_s29  ;;  %p566_p0 = pneg %p789_p11 }
  0x33   : > { %s569_s4 = scalar_lea.hbm %s903_s0, 256  ;;  %p570_p7 = scmp.lt.u32.totalorder %s787_s27, %s903_s0 }
  0x34   : > { %p567_p3 = pnand %p566_p0, %p565_p13  ;;  %p571_p9 = scmp.lt.u32.totalorder %s569_s4, %s564_s29 }
  0x35   : > { %p573_p1 = scmp.lt.u32.totalorder %s564_s29, %s787_s27 }
  0x36   : > { %p568_p5 = pneg %p567_p3  ;;  %p572_p2 = por %p571_p9, %p570_p7 }
  0x38   : > { %p574_p4 = por %p573_p1, %p572_p2 }
  0x3a   : > { %p575_p6 = pnand %p574_p4, %p568_p5 }
  0x3c   : > { %578 = shalt.err (!%p575_p6)
}
  0x3d   : > { %s579_s7 = scalar_lea.vmem %s793_s22, 128  ;;  %s669_s18 = smov [#allocation2]  }
  0x3e   : > { %p580_p8 = scmp.ne.s32.totalorder %s793_s22, %s579_s7  ;;  %s584_s24 = sshll.u32 %s669_s18, 4  ;;  %s585_s24 = int_to_ptr.vmem [resolvable:$false] %s584_s24 }
  0x3f   : > { %s586_s25 = scalar_lea.vmem %s585_s24, 256  ;;  %p587_p3 = scmp.lt.s32.totalorder %s793_s22, %s585_s24 }
  0x40   : > { %p582_p10 = pnand %p580_p8, %p566_p0  ;;  %p588_p7 = scmp.lt.s32.totalorder %s586_s25, %s579_s7 }
  0x42   : > { %p583_p13 = pneg %p582_p10  ;;  %p589_p9 = por %p588_p7, %p587_p3 }
  0x44   : > { %p590_p2 = pnand %p589_p9, %p583_p13 }
  0x46   : > { %593 = shalt.err (!%p590_p2)
}
  0x47   : > { %491 = dma.hbm_to_vmem [thread:$0]  (!%p789_p11), %s787_s27, 128, %s793_s22, %s124_s28  }
  0x48   : > { %p916_p5 = scmp.ne.s32.totalorder %s911_s17, 0 }
  0x49   : > { %s823_s20 = sand.u32 (!%p916_p5), 1, %s656_s10   ;;  %p917_p0 = scmp.ne.s32.totalorder (!%p916_p5), %s909_s15, 0 }
  0x4a   : > { %143 = sbr.rel (%p916_p5) target bundleno = 2232 (0x8b8), region = 28  ;;  %s459_s26 = sshll.u32 (!%p916_p5), %s823_s20, 3 }
  0x4b   : > { %s146_s19 = scalar_lea.sflag (!%p916_p5), [#allocation3], %s823_s20  ;;  %s149_s29 = scalar_lea.vmem (!%p916_p5), [#allocation2], %s459_s26 }
  0x51   : > { %639 = dma.done.wait (%p917_p0), %s146_s19, 128  }
  0x52   : > { %641 = vsyncadd (%p917_p0), %s146_s19, 4294967168  ;;  %p918_p11 = scmp.eq.s32.totalorder %s708_s13, 0 }
  0x54   : > { %643 = dma.done.wait (%p918_p11), [#allocation6], 1024   ;;  %p919_p1 = pmov %p918_p11 }
  0x55   : > { %v670_v0 = vmov 0.0   ;;  %v176_v1 = vld [vmem:[#allocation5 + $0x8] sm:$0xff]  ;;  %v178_v2 = vld [vmem:[#allocation5 + $0x18] sm:$0xff]  ;;  %v175_v3 = vld [vmem:[#allocation5] sm:$0xff]  ;;  %vm183_vm0 = vcmask 261120   ;;  %v262_v14 = vlaneseq  ;;  %s463_s15 = sshll.u32 %s708_s13, 3 }
  0x56   : > { %645 = vsyncadd (%p919_p1), [#allocation6], 4294966272  ;;  %251 = vmatprep.mubr.f32.mxu0 %v670_v0  ;;  %v468_v4 = vpack.c.bf16 %v178_v2, %v176_v1  ;;  %v177_v5 = vld [vmem:[#allocation5 + $0x10] sm:$0xff]  ;;  %v180_v6 = vld [vmem:[#allocation5 + $0x28] sm:$0xff]  ;;  %v264_v16 = vstv %s463_s15  ;;  %s465_s17 = sshll.u32 %s708_s13, 7  ;;  %s173_s27 = scalar_lea.vmem [#allocation7], %s459_s26 }
  0x57   : > { %v182_v7 = vld [vmem:[#allocation5 + $0x38] sm:$0xff]  ;;  %v470_v8 = vpack.c.bf16 %v177_v5, %v175_v3  ;;  %v179_v10 = vld [vmem:[#allocation5 + $0x20] sm:$0xff]  ;;  %v181_v11 = vld [vmem:[#allocation5 + $0x30] sm:$0xff]  ;;  %v263_v15 = vshrl.u32 %v262_v14, 7  ;;  %v840_v19 = vand.u32 127, %v262_v14  ;;  %s372_s22 = sshll.u32 %s173_s27, 4  ;;  %s859_s30 = scalar_lea.hbm %s905_s2, %s465_s17  ;;  %s861_s22 = int_to_ptr.vmem [resolvable:$true] %s372_s22 }
  0x58   : > { %v472_v9 = vpack.c.bf16 %v182_v7, %v180_v6  ;;  %469 = vmatprep.subr.bf16.mxu0 %v468_v4  ;;  %v474_v12 = vpack.c.bf16 %v181_v11, %v179_v10  ;;  %v174_v13 = vld [vmem:[%s149_s29] sm:$0xff]  ;;  %s359_s13 = scalar_lea.sflag [#allocation4], %s823_s20  ;;  %s594_s3 = scalar_lea.vmem %s861_s22, 128 }
  0x59   : > { %471 = vmatpush1.bf16.msra.mxu0 %v470_v8  ;;  %v838_v17 = vadd.s32 %v264_v16, %v263_v15  ;;  %vm270_vm2 = vcmp.lt.s32.totalorder %v840_v19, 17  ;;  %p595_p4 = scmp.ne.s32.totalorder %s861_s22, %s594_s3  ;;  %s671_s4 = smov [#allocation7]  }
  0x5a   : > { %473 = vmatprep.subr.bf16.mxu0 %v472_v9  ;;  %s598_s5 = sshll.u32 %s671_s4, 4  ;;  %s599_s5 = int_to_ptr.vmem [resolvable:$false] %s598_s5 }
  0x5b   : > { %vm266_vm1 = vcmp.lt.s32.totalorder %v838_v17, 8  ;;  %vm354_vm15 = vcmp.lt.s32.totalorder %v838_v17, 16  ;;  %p596_p6 = pnand %p595_p4, %p778_p12  ;;  %s600_s6 = scalar_lea.vmem %s599_s5, 256 }
  0x5c   : > { %p601_p10 = scmp.lt.s32.totalorder %s861_s22, %s599_s5  ;;  %p602_p13 = scmp.lt.s32.totalorder %s600_s6, %s594_s3 }
  0x5d   : > { %475 = vmatpush1.bf16.msra.mxu0 %v474_v12  ;;  %p597_p8 = pneg %p596_p6 }
  0x5e   : > { %p603_p3 = por %p602_p13, %p601_p10 }
  0x60   : > { %462 = vmatmul.mubr.msk.f32.vlgmr.msra.gmra.mrb[0].mxu0 %vm183_vm0, %v174_v13  ;;  %vm356_vm0 = vcmask 7168   ;;  %p604_p7 = pnand %p603_p3, %p597_p8 }
 0x133   : > { %v253_v18 = vpop.f32.mrb[0].mxu0 }
 0x134   : > { %v258_v20 = vmul.f32 %v253_v18, %v253_v18  ;;  %v255_v21 = vpop.f32.mrb[1].mxu0 }
 0x135   : > { %v259_v22 = vmul.f32 %v255_v21, %v255_v21 }
 0x137   : > { %v260_v23 = vadd.f32 %v259_v22, %v258_v20 }
 0x139   : > { %v267_v24 = vsel %vm266_vm1, 0.0, %v260_v23 }
 0x13a   : > { %v271_v25 = vsel %vm270_vm2, %v267_v24, -inf }
 0x13b   : > { %272 = vmax.xlane.f32.xlu0 %v271_v25 }
 0x1c8   : > { %v273_v26 = vpop.xlane.xlu0 %272 }
 0x1c9   : > { %vm274_vm3 = vcmp.eq.f32.partialorder %v271_v25, %v273_v26 }
 0x1ca   : > { %v275_v27 = vsel %vm274_vm3, %v840_v19, 128 }
 0x1cb   : > { %v277_v28 = vshra.s32 %v275_v27, 16  ;;  %v276_v30 = vand.u32 65535, %v275_v27 }
 0x1cd   : > { %v279_v29 = vcvt.s32.f32 %v277_v28  ;;  %v278_v32 = vcvt.s32.f32 %v276_v30 }
 0x1cf   : > { %280 = vmin.xlane.f32.xlu0 %v279_v29 }
 0x25c   : > { %v281_v31 = vpop.xlane.xlu0 %280 }
 0x25d   : > { %vm282_vm4 = vcmp.eq.f32.partialorder %v279_v29, %v281_v31  ;;  %v287_v34 = vcvt.f32.s32 %v281_v31 }
 0x25e   : > { %v283_v33 = vsel %vm282_vm4, %v278_v32, inf }
 0x25f   : > { %284 = vmin.xlane.f32.xlu1 %v283_v33  ;;  %v288_v36 = vshll.u32 %v287_v34, 16 }
 0x2ec   : > { %v285_v35 = vpop.xlane.xlu1 %284 }
 0x2ed   : > { %v286_v37 = vcvt.f32.s32 %v285_v35 }
 0x2ef   : > { %v289_v38 = vadd.s32 %v288_v36, %v286_v37 }
 0x2f1   : > { %vm290_vm5 = vcmp.eq.s32.totalorder %v840_v19, %v289_v38 }
 0x2f2   : > { %v291_v39 = vsel %vm290_vm5, -inf, %v271_v25 }
 0x2f3   : > { %292 = vmax.xlane.f32.xlu1 %v291_v39 }
 0x380   : > { %v293_v40 = vpop.xlane.xlu1 %292 }
 0x381   : > { %vm294_vm6 = vcmp.eq.f32.partialorder %v291_v39, %v293_v40 }
 0x382   : > { %v295_v41 = vsel %vm294_vm6, %v840_v19, 128 }
 0x383   : > { %v297_v42 = vshra.s32 %v295_v41, 16  ;;  %v296_v44 = vand.u32 65535, %v295_v41 }
 0x385   : > { %v299_v43 = vcvt.s32.f32 %v297_v42  ;;  %v298_v46 = vcvt.s32.f32 %v296_v44 }
 0x387   : > { %300 = vmin.xlane.f32.xlu0 %v299_v43 }
 0x414   : > { %v301_v45 = vpop.xlane.xlu0 %300 }
 0x415   : > { %vm302_vm7 = vcmp.eq.f32.partialorder %v299_v43, %v301_v45  ;;  %v307_v48 = vcvt.f32.s32 %v301_v45 }
 0x416   : > { %v303_v47 = vsel %vm302_vm7, %v298_v46, inf }
 0x417   : > { %304 = vmin.xlane.f32.xlu1 %v303_v47  ;;  %v308_v50 = vshll.u32 %v307_v48, 16 }
 0x4a4   : > { %v305_v49 = vpop.xlane.xlu1 %304 }
 0x4a5   : > { %v306_v51 = vcvt.f32.s32 %v305_v49 }
 0x4a7   : > { %v309_v52 = vadd.s32 %v308_v50, %v306_v51 }
 0x4a9   : > { %vm310_vm8 = vcmp.eq.s32.totalorder %v840_v19, %v309_v52 }
 0x4aa   : > { %v311_v53 = vsel %vm310_vm8, -inf, %v291_v39 }
 0x4ab   : > { %312 = vmax.xlane.f32.xlu0 %v311_v53 }
 0x538   : > { %v313_v54 = vpop.xlane.xlu0 %312 }
 0x539   : > { %vm314_vm9 = vcmp.eq.f32.partialorder %v311_v53, %v313_v54 }
 0x53a   : > { %v315_v55 = vsel %vm314_vm9, %v840_v19, 128 }
 0x53b   : > { %v317_v56 = vshra.s32 %v315_v55, 16  ;;  %v316_v58 = vand.u32 65535, %v315_v55 }
 0x53d   : > { %v319_v57 = vcvt.s32.f32 %v317_v56  ;;  %v318_v60 = vcvt.s32.f32 %v316_v58 }
 0x53f   : > { %320 = vmin.xlane.f32.xlu1 %v319_v57 }
 0x5cc   : > { %v321_v59 = vpop.xlane.xlu1 %320 }
 0x5cd   : > { %vm322_vm10 = vcmp.eq.f32.partialorder %v319_v57, %v321_v59  ;;  %v327_v62 = vcvt.f32.s32 %v321_v59 }
 0x5ce   : > { %v323_v61 = vsel %vm322_vm10, %v318_v60, inf }
 0x5cf   : > { %324 = vmin.xlane.f32.xlu0 %v323_v61  ;;  %v328_v0 = vshll.u32 %v327_v62, 16 }
 0x65c   : > { %v325_v63 = vpop.xlane.xlu0 %324 }
 0x65d   : > { %v326_v1 = vcvt.f32.s32 %v325_v63 }
 0x65f   : > { %v329_v2 = vadd.s32 %v328_v0, %v326_v1 }
 0x661   : > { %vm330_vm11 = vcmp.eq.s32.totalorder %v840_v19, %v329_v2 }
 0x662   : > { %v331_v3 = vsel %vm330_vm11, -inf, %v311_v53 }
 0x663   : > { %332 = vmax.xlane.f32.xlu1 %v331_v3 }
 0x6f0   : > { %v333_v4 = vpop.xlane.xlu1 %332 }
 0x6f1   : > { %vm334_vm12 = vcmp.eq.f32.partialorder %v331_v3, %v333_v4 }
 0x6f2   : > { %v335_v5 = vsel %vm334_vm12, %v840_v19, 128 }
 0x6f3   : > { %v337_v6 = vshra.s32 %v335_v5, 16  ;;  %v336_v8 = vand.u32 65535, %v335_v5 }
 0x6f5   : > { %v339_v7 = vcvt.s32.f32 %v337_v6  ;;  %v338_v10 = vcvt.s32.f32 %v336_v8 }
 0x6f7   : > { %340 = vmin.xlane.f32.xlu0 %v339_v7 }
 0x784   : > { %v341_v9 = vpop.xlane.xlu0 %340 }
 0x785   : > { %vm342_vm13 = vcmp.eq.f32.partialorder %v339_v7, %v341_v9  ;;  %v347_v12 = vcvt.f32.s32 %v341_v9 }
 0x786   : > { %v343_v11 = vsel %vm342_vm13, %v338_v10, inf }
 0x787   : > { %344 = vmin.xlane.f32.xlu1 %v343_v11  ;;  %v348_v14 = vshll.u32 %v347_v12, 16 }
 0x814   : > { %v345_v13 = vpop.xlane.xlu1 %344 }
 0x815   : > { %v346_v15 = vcvt.f32.s32 %v345_v13 }
 0x817   : > { %v349_v16 = vadd.s32 %v348_v14, %v346_v15 }
 0x819   : > { %vm350_vm14 = vcmp.eq.s32.totalorder %v840_v19, %v349_v16 }
 0x81a   : > { %v351_v18 = vsel %vm350_vm14, -inf, %v331_v3 }
 0x81b   : > { %352 = vmax.xlane.f32.xlu0 %v351_v18 }
 0x8a8   : > { %v353_v20 = vpop.xlane.xlu0 %352 }
 0x8a9   : > { %v355_v19 = vsel %vm354_vm15, %v353_v20, inf }
 0x8aa   : > { %357 = vst.msk [vmem:[%s173_s27] sm:$0xff] %vm356_vm0, %v355_v19 }
 0x8ab   : > { %607 = shalt.err (!%p604_p7)
}
 0x8ac   : > { %s608_s7 = scalar_lea.hbm %s859_s30, 128  ;;  %s612_s25 = scalar_lea.hbm %s905_s2, 256 }
 0x8ad   : > { %p609_p9 = scmp.ne.s32.totalorder %s859_s30, %s608_s7  ;;  %p613_p0 = scmp.lt.u32.totalorder %s859_s30, %s905_s2 }
 0x8ae   : > { %p614_p11 = scmp.lt.u32.totalorder %s612_s25, %s608_s7  ;;  %p616_p4 = scmp.lt.u32.totalorder %s608_s7, %s859_s30 }
 0x8af   : > { %p610_p2 = pnand %p609_p9, %p778_p12 }
 0x8b0   : > { %p615_p1 = por %p614_p11, %p613_p0 }
 0x8b1   : > { %p611_p5 = pneg %p610_p2 }
 0x8b2   : > { %p617_p6 = por %p616_p4, %p615_p1 }
 0x8b4   : > { %p618_p8 = pnand %p617_p6, %p611_p5 }
 0x8b6   : > { %621 = shalt.err (!%p618_p8)
}
 0x8b7   : > { %482 = dma.vmem_to_hbm [thread:$0]  (%p778_p12), %s861_s22, 128, %s859_s30, %s359_s13  }
 0x8b8 PF: > { %s384_s19 = sand.u32 1, %s652_s9   ;;  %p920_p10 = scmp.ne.s32.totalorder %s910_s16, 0 }
 0x8b9   : > { %p921_p13 = scmp.ge.s32.totalorder %s664_s12, 2  ;;  %s385_s29 = scalar_lea.sflag [#allocation4], %s384_s19 }
 0x8bb   : > { %p493_p3 = pnand %p921_p13, %p920_p10 }
 0x8bd   : > { %647 = dma.done.wait (!%p493_p3), %s385_s29, 128  }
 0x8be   : > { %649 = vsyncadd (!%p493_p3), %s385_s29, 4294967168  ;;  %p16_p7 = scmp.ge.s32.totalorder %s743_s21, 4   ;;  %s922_s9 = smov %s656_s10 }
 0x8bf   : > { %s923_s10 = smov %s660_s11  ;;  %s924_s11 = smov %s774_s8 }
 0x8c0   : > { %s925_s12 = smov %s743_s21  ;;  %18 = sbr.rel (!%p16_p7) target bundleno = 6 (0x6), region = 77 }
 0x8c7   :  { %390 = vsyncpa [#allocation3], 1 }
 0x8c8   :  { %392 = vsyncpa [#allocation3 + $0x1], 1 }
 0x8c9   :  { %393 = vsyncpa [#allocation6], 1 }
 0x8ca   :  { %394 = vsyncpa [#allocation4], 1 }
 0x8cb   :  { %396 = vsyncpa [#allocation4 + $0x1], 1 }

// kernel: dft_series_decomp.3
= control target key start
LH: loop header
LB: loop body
LE: loop exit
PB: predicated region body
PF: predicated region fallthrough
CT: control target
= control target key end

     0   :  { %s1502_s0 = inlined_call_operand.<no memory space> [shape: f32[1], index: 0, kind: input, shape index: {}]   ;;  %s1503_s1 = inlined_call_operand.hbm [shape: f32[16,32], index: 1, kind: input, shape index: {}]   ;;  %s1504_s2 = inlined_call_operand.hbm [shape: f32[32,256], index: 2, kind: input, shape index: {}]   ;;  %s1505_s3 = inlined_call_operand.hbm [shape: f32[256,32], index: 3, kind: input, shape index: {}]   ;;  %s1506_s4 = inlined_call_operand.hbm [shape: f32[16,32], index: 4, kind: output, shape index: {0}]   ;;  %s1507_s5 = inlined_call_operand.hbm [shape: f32[16,32], index: 5, kind: output, shape index: {1}]  }
   0x1   :  { %11 = sst [smem:[#allocation2]] %s1502_s0 }
   0x2   :  { %12 = vsyncpa [#allocation4], 0 }
   0x3   :  { %14 = vsyncpa [#allocation4 + $0x1], 0 }
   0x4   :  { %15 = vsyncpa [#allocation7], 0 }
   0x5   :  { %16 = vsyncpa [#allocation5], 0 }
   0x6   :  { %18 = vsyncpa [#allocation5 + $0x1], 0 }
   0x7   :  { %19 = vsyncpa [#allocation11], 0 }
   0x8   :  { %21 = vsyncpa [#allocation11 + $0x1], 0  ;;  %s1206_s20 = smov 0   ;;  %s1208_s21 = smov 0  }
   0x9   :  { %s1210_s22 = smov 0   ;;  %s1212_s23 = smov 0  }
   0xa LB: > { %s1227_s0 = sadd.s32 4294967295, %s1159_s23   ;;  %s708_s24 = sadd.s32 4294967294, %s1159_s23   ;;  %s1159_s23 = sphi %s1212_s23, %s1527_s23   ;;  %s1155_s22 = sphi %s1210_s22, %s1526_s22   ;;  %s1151_s21 = sphi %s1208_s21, %s1525_s21   ;;  %s1147_s20 = sphi %s1206_s20, %s1524_s20  }
   0xb   : > { %p68_p0 = scmp.ne.s32.totalorder %s1151_s21, %s1147_s20  ;;  %p1508_p1 = scmp.eq.s32.totalorder %s1227_s0, 0 }
   0xc   : > { %p140_p3 = scmp.eq.s32.totalorder %s708_s24, 1  ;;  %p709_p5 = scmp.ge.s32.totalorder %s1159_s23, 1 }
   0xd   : > { %p1236_p4 = por %p1508_p1, %p68_p0  ;;  %p173_p7 = scmp.lt.s32.totalorder %s1159_s23, 3 }
   0xe   : > { %p1241_p6 = por %p140_p3, %p68_p0  ;;  %s1161_s28 = smov [#allocation6]  }
   0xf   : > { %s1511_s25 = scalar_select %p1236_p4, 1, 0 }
  0x10   : > { %s1512_s26 = scalar_select %p1241_p6, 1, 0 }
  0x11   : > { %p1246_p8 = pnand %p709_p5, %p173_p7  ;;  %s188_s29 = sshll.u32 %s1161_s28, 4  ;;  %s1250_s29 = int_to_ptr.vmem [resolvable:$true] %s188_s29 }
  0x12   : > { %s1162_s6 = smov [#allocation8]   ;;  %s971_s10 = scalar_lea.hbm %s1504_s2, 1024 }
  0x13   : > { %p906_p9 = pneg %p1246_p8  ;;  %s201_s7 = sshll.u32 %s1162_s6, 4  ;;  %s1261_s7 = int_to_ptr.vmem [resolvable:$true] %s201_s7 }
  0x14   : > { %p972_p12 = scmp.ne.s32.totalorder %s1504_s2, %s971_s10  ;;  %p978_p5 = scmp.lt.u32.totalorder %s971_s10, %s1504_s2 }
  0x15   : > { %p1257_p11 = pnand %p906_p9, %p1508_p1 }
  0x17   : > { %p973_p13 = pneg %p1257_p11 }
  0x19   : > { %p974_p0 = pnand %p973_p13, %p972_p12 }
  0x1b   : > { %p975_p3 = pneg %p974_p0 }
  0x1d   : > { %p980_p7 = pnand %p978_p5, %p975_p3 }
  0x1f   : > { %983 = shalt.err (!%p980_p7)
}
  0x20   : > { %s984_s15 = scalar_lea.vmem %s1250_s29, 1024  ;;  %p992_p2 = scmp.lt.s32.totalorder %s1250_s29, %s1250_s29 }
  0x21   : > { %p985_p9 = scmp.ne.s32.totalorder %s1250_s29, %s984_s15  ;;  %p993_p12 = scmp.lt.s32.totalorder %s984_s15, %s984_s15 }
  0x23   : > { %p987_p10 = pnand %p985_p9, %p973_p13  ;;  %p994_p0 = por %p993_p12, %p992_p2 }
  0x25   : > { %p988_p1 = pneg %p987_p10 }
  0x27   : > { %p995_p6 = pnand %p994_p0, %p988_p1 }
  0x29   : > { %998 = shalt.err (!%p995_p6)
}
  0x2a   : > { %s1163_s16 = smov 256   ;;  %s1164_s17 = smov 16  }
  0x2b   : > { %909 = dma.hbm_to_vmem [thread:$0]  (!%p1257_p11), %s1504_s2, 1024, %s1250_s29, [#allocation7], %s1163_s16, %s1163_s16, %s1164_s17  }
  0x2c   : > { %s999_s6 = scalar_lea.hbm %s1505_s3, 4096 }
  0x2d   : > { %p1000_p2 = scmp.ne.s32.totalorder %s1505_s3, %s999_s6  ;;  %p1006_p10 = scmp.lt.u32.totalorder %s999_s6, %s1505_s3 }
  0x2f   : > { %p1002_p1 = pnand %p1000_p2, %p973_p13 }
  0x31   : > { %p1003_p6 = pneg %p1002_p1 }
  0x33   : > { %p1008_p3 = pnand %p1006_p10, %p1003_p6 }
  0x35   : > { %1011 = shalt.err (!%p1008_p3)
}
  0x36   : > { %s1012_s29 = scalar_lea.vmem %s1261_s7, 4096  ;;  %p1020_p12 = scmp.lt.s32.totalorder %s1261_s7, %s1261_s7 }
  0x37   : > { %p1013_p5 = scmp.ne.s32.totalorder %s1261_s7, %s1012_s29  ;;  %p1021_p0 = scmp.lt.s32.totalorder %s1012_s29, %s1012_s29 }
  0x39   : > { %p1015_p7 = pnand %p1013_p5, %p973_p13  ;;  %p1022_p2 = por %p1021_p0, %p1020_p12 }
  0x3b   : > { %p1016_p9 = pneg %p1015_p7 }
  0x3d   : > { %p1023_p1 = pnand %p1022_p2, %p1016_p9 }
  0x3f   : > { %1026 = shalt.err (!%p1023_p1)
}
  0x40   : > { %s1165_s12 = smov 128   ;;  %s1166_s13 = smov 8  }
  0x41   : > { %912 = dma.hbm_to_vmem [thread:$0]  (!%p1257_p11), %s1505_s3, 4096, %s1261_s7, [#allocation7], %s1165_s12, %s1165_s12, %s1166_s13  }
  0x42   : > { %s1316_s16 = sadd.s32 1, %s1159_s23   ;;  %s55_s18 = sadd.s32 1, %s1155_s22 }
  0x43   : > { %s52_s17 = ssub.s32 %s1159_s23, %s1316_s16  ;;  %p62_p6 = scmp.ne.s32.totalorder %s1155_s22, %s1151_s21 }
  0x44   : > { %p53_p13 = scmp.eq.s32.totalorder %s52_s17, 0  ;;  %p63_p10 = scmp.eq.s32.totalorder %s1159_s23, 0 }
  0x45   : > { %p1515_p5 = scmp.eq.s32.totalorder %s1227_s0, 1  ;;  %p926_p9 = scmp.lt.s32.totalorder %s1159_s23, 2 }
  0x46   : > { %s1325_s19 = scalar_select %p53_p13, %s1155_s22, %s55_s18  }
  0x47   : > { %p64_p3 = por %p63_p10, %p62_p6  ;;  %p1329_p7 = por %p1515_p5, %p62_p6 }
  0x48   : > { %s215_s30 = sand.u32 1, %s1155_s22   ;;  %s714_s7 = sshll.u32 %s1159_s23, 7 }
  0x49   : > { %s1516_s24 = scalar_select %p1329_p7, 1, 0 }
  0x4a   : > { %s713_s28 = sshll.u32 %s215_s30, 3  ;;  %s1339_s9 = scalar_lea.hbm %s1503_s1, %s714_s7 }
  0x4b   : > { %s219_s10 = scalar_lea.vmem [#allocation3], %s713_s28  ;;  %p1343_p11 = pnand %p926_p9, %p64_p3 }
  0x4c   : > { %s226_s11 = sshll.u32 %s219_s10, 4  ;;  %s216_s12 = scalar_lea.sflag [#allocation4], %s215_s30  ;;  %s1341_s11 = int_to_ptr.vmem [resolvable:$true] %s226_s11 }
  0x4d   : > { %s1027_s13 = scalar_lea.hbm %s1339_s9, 128  ;;  %p1029_p0 = pneg %p1343_p11 }
  0x4e   : > { %p1028_p12 = scmp.ne.s32.totalorder %s1339_s9, %s1027_s13  ;;  %s1032_s17 = scalar_lea.hbm %s1503_s1, 256 }
  0x4f   : > { %p1033_p13 = scmp.lt.u32.totalorder %s1339_s9, %s1503_s1  ;;  %p1034_p6 = scmp.lt.u32.totalorder %s1032_s17, %s1027_s13 }
  0x50   : > { %p1030_p2 = pnand %p1029_p0, %p1028_p12  ;;  %p1036_p3 = scmp.lt.u32.totalorder %s1027_s13, %s1339_s9 }
  0x51   : > { %p1035_p10 = por %p1034_p6, %p1033_p13 }
  0x52   : > { %p1031_p1 = pneg %p1030_p2 }
  0x53   : > { %p1037_p5 = por %p1036_p3, %p1035_p10 }
  0x55   : > { %p1038_p9 = pnand %p1037_p5, %p1031_p1 }
  0x57   : > { %1041 = shalt.err (!%p1038_p9)
}
  0x58   : > { %s1042_s30 = scalar_lea.vmem %s1341_s11, 128  ;;  %s1167_s7 = smov [#allocation3]  }
  0x59   : > { %p1043_p12 = scmp.ne.s32.totalorder %s1341_s11, %s1042_s30  ;;  %s1047_s6 = sshll.u32 %s1167_s7, 4  ;;  %s1048_s6 = int_to_ptr.vmem [resolvable:$false] %s1047_s6 }
  0x5a   : > { %s1049_s8 = scalar_lea.vmem %s1048_s6, 256  ;;  %p1050_p4 = scmp.lt.s32.totalorder %s1341_s11, %s1048_s6 }
  0x5b   : > { %p1045_p2 = pnand %p1043_p12, %p1029_p0  ;;  %p1051_p13 = scmp.lt.s32.totalorder %s1049_s8, %s1042_s30 }
  0x5d   : > { %p1046_p7 = pneg %p1045_p2  ;;  %p1052_p6 = por %p1051_p13, %p1050_p4 }
  0x5f   : > { %p1053_p10 = pnand %p1052_p6, %p1046_p7 }
  0x61   : > { %1056 = shalt.err (!%p1053_p10)
}
  0x62   : > { %916 = dma.hbm_to_vmem [thread:$0]  (!%p1343_p11), %s1339_s9, 128, %s1341_s11, %s216_s12  }
  0x63   : > { %235 = sbr.rel (%p1246_p8) target bundleno = 591 (0x24f), region = 36  ;;  %s1375_s10 = sand.u32 (!%p1246_p8), 1, %s1151_s21  }
  0x64   : > { %s1378_s13 = sshll.u32 (!%p1246_p8), %s1375_s10, 3  ;;  %s238_s14 = scalar_lea.sflag (!%p1246_p8), [#allocation4], %s1375_s10 }
  0x65   : > { %s241_s15 = scalar_lea.vmem (!%p1246_p8), [#allocation3], %s1378_s13  ;;  %p1518_p4 = scmp.ne.s32.totalorder (!%p1246_p8), %s1511_s25, 0 }
  0x6a   : > { %1130 = dma.done.wait (%p1518_p4), %s238_s14, 128  }
  0x6b   : > { %1132 = vsyncadd (%p1518_p4), %s238_s14, 4294967168  ;;  %p1519_p7 = scmp.eq.s32.totalorder %s1227_s0, 0 }
  0x6d   : > { %1134 = dma.done.wait (%p1519_p7), [#allocation7], 5120   ;;  %p1520_p8 = pmov %p1519_p7 }
  0x6e   : > { %v1168_v0 = vmov 0.0   ;;  %v1169_v1 = vmov 0.0|0.0   ;;  %v283_v2 = vld [vmem:[#allocation6 + $0x8] sm:$0xff]  ;;  %v285_v3 = vld [vmem:[#allocation6 + $0x18] sm:$0xff]  ;;  %v282_v4 = vld [vmem:[#allocation6] sm:$0xff]  ;;  %vm290_vm0 = vcmask 261120   ;;  %v369_v63 = vlaneseq }
  0x6f   : > { %1136 = vsyncadd (%p1520_p8), [#allocation7], 4294962176  ;;  %358 = vmatprep.mubr.f32.mxu0 %v1168_v0  ;;  %867 = vmatprep.subr.bf16.mxu1 %v1169_v1  ;;  %v835_v5 = vpack.c.bf16 %v285_v3, %v283_v2  ;;  %v284_v6 = vld [vmem:[#allocation6 + $0x10] sm:$0xff]  ;;  %v287_v7 = vld [vmem:[#allocation6 + $0x28] sm:$0xff]  ;;  %vm1170_vm1 = vmmov 0   ;;  %s722_s25 = sshll.u32 %s1227_s0, 3 }
  0x70   : > { %v289_v8 = vld [vmem:[#allocation6 + $0x38] sm:$0xff]  ;;  %v837_v9 = vpack.c.bf16 %v284_v6, %v282_v4  ;;  %v286_v11 = vld [vmem:[#allocation6 + $0x20] sm:$0xff]  ;;  %v288_v12 = vld [vmem:[#allocation6 + $0x30] sm:$0xff]  ;;  %832 = vmatprep.mubr.msk.f32.mxu1 %vm1170_vm1, %v1168_v0  ;;  %s374_s27 = sld [smem:[#allocation2]]  ;;  %v370_v2 = vshrl.u32 %v369_v63, 7  ;;  %v371_v3 = vstv %s722_s25  ;;  %s727_s9 = sshll.u32 %s1227_s0, 7 }
  0x71   : > { %v839_v10 = vpack.c.bf16 %v289_v8, %v287_v7  ;;  %836 = vmatprep.subr.bf16.mxu0 %v835_v5  ;;  %v380_v13 = vld [vmem:[#allocation8] sm:$0xff]  ;;  %v841_v14 = vpack.c.bf16 %v288_v12, %v286_v11  ;;  %v381_v16 = vld [vmem:[#allocation8 + $0x8] sm:$0xff]  ;;  %v382_v19 = vld [vmem:[#allocation8 + $0x10] sm:$0xff]  ;;  %s273_s11 = scalar_lea.vmem [#allocation9], %s1378_s13  ;;  %s280_s12 = scalar_lea.vmem [#allocation10], %s1378_s13 }
  0x72   : > { %838 = vmatpush1.bf16.msra.mxu0 %v837_v9  ;;  %v396_v15 = vld [vmem:[#allocation8 + $0x80] sm:$0xff]  ;;  %v397_v17 = vld [vmem:[#allocation8 + $0x88] sm:$0xff]  ;;  %v868_v18 = vpack.c.bf16 %v381_v16, %v380_v13  ;;  %v383_v20 = vld [vmem:[#allocation8 + $0x18] sm:$0xff]  ;;  %v372_v5 = vadd.s32 %v371_v3, %v370_v2  ;;  %s574_s29 = sshll.u32 %s273_s11, 4  ;;  %s587_s17 = sshll.u32 %s280_s12, 4  ;;  %s1426_s29 = int_to_ptr.vmem [resolvable:$true] %s574_s29  ;;  %s1435_s17 = int_to_ptr.vmem [resolvable:$true] %s587_s17 }
  0x73   : > { %840 = vmatprep.subr.bf16.mxu0 %v839_v10  ;;  %v871_v21 = vpack.c.bf16 %v383_v20, %v382_v19  ;;  %v1394_v22 = vld [vmem:[%s241_s15] sm:$0xff]  ;;  %v844_v23 = vpack.c.bf16 %v397_v17, %v396_v15  ;;  %v384_v24 = vld [vmem:[#allocation8 + $0x20] sm:$0xff]  ;;  %v385_v25 = vld [vmem:[#allocation8 + $0x28] sm:$0xff]  ;;  %s1424_s30 = scalar_lea.hbm %s1506_s4, %s727_s9  ;;  %s1433_s6 = scalar_lea.hbm %s1507_s5, %s727_s9 }
  0x74   : > { %869 = vmatpush3.bf16.msra.mxu1 %v868_v18  ;;  %v398_v26 = vld [vmem:[#allocation8 + $0x90] sm:$0xff]  ;;  %v399_v27 = vld [vmem:[#allocation8 + $0x98] sm:$0xff]  ;;  %v874_v28 = vpack.c.bf16 %v385_v25, %v384_v24  ;;  %v400_v32 = vld [vmem:[#allocation8 + $0xa0] sm:$0xff]  ;;  %vm373_vm2 = vcmp.ge.s32.totalorder %v372_v5, 8  ;;  %s556_s8 = scalar_lea.sflag [#allocation5], %s1375_s10  ;;  %s1057_s14 = scalar_lea.vmem %s1426_s29, 128 }
  0x75   : > { %870 = vmatprep.subr.bf16.mxu1 %v1169_v1  ;;  %v847_v29 = vpack.c.bf16 %v399_v27, %v398_v26  ;;  %v386_v30 = vld [vmem:[#allocation8 + $0x30] sm:$0xff]  ;;  %v387_v31 = vld [vmem:[#allocation8 + $0x38] sm:$0xff]  ;;  %v401_v33 = vld [vmem:[#allocation8 + $0xa8] sm:$0xff]  ;;  %p1058_p11 = scmp.ne.s32.totalorder %s1426_s29, %s1057_s14  ;;  %p1521_p0 = scmp.ne.s32.totalorder %s1516_s24, 0 }
  0x76   : > { %842 = vmatpush1.bf16.msra.mxu0 %v841_v14  ;;  %v877_v34 = vpack.c.bf16 %v387_v31, %v386_v30  ;;  %v850_v35 = vpack.c.bf16 %v401_v33, %v400_v32  ;;  %v388_v36 = vld [vmem:[#allocation8 + $0x40] sm:$0xff]  ;;  %v389_v37 = vld [vmem:[#allocation8 + $0x48] sm:$0xff]  ;;  %v402_v38 = vld [vmem:[#allocation8 + $0xb0] sm:$0xff]  ;;  %v375_v8 = vstv %s374_s27  ;;  %s1171_s15 = smov [#allocation9]  }
  0x77   : > { %843 = vmatprep.subr.bf16.mxu0 %v1169_v1  ;;  %v403_v39 = vld [vmem:[#allocation8 + $0xb8] sm:$0xff]  ;;  %v880_v40 = vpack.c.bf16 %v389_v37, %v388_v36  ;;  %v390_v42 = vld [vmem:[#allocation8 + $0x50] sm:$0xff]  ;;  %v404_v44 = vld [vmem:[#allocation8 + $0xc0] sm:$0xff]  ;;  %p1059_p1 = pnand %p1058_p11, %p1521_p0  ;;  %s1061_s25 = sshll.u32 %s1171_s15, 4  ;;  %s1062_s25 = int_to_ptr.vmem [resolvable:$false] %s1061_s25 }
  0x78   : > { %872 = vmatpush3.bf16.msra.mxu1 %v871_v21  ;;  %v853_v41 = vpack.c.bf16 %v403_v39, %v402_v38  ;;  %v391_v43 = vld [vmem:[#allocation8 + $0x58] sm:$0xff]  ;;  %v405_v45 = vld [vmem:[#allocation8 + $0xc8] sm:$0xff]  ;;  %v406_v48 = vld [vmem:[#allocation8 + $0xd0] sm:$0xff]  ;;  %s1063_s27 = scalar_lea.vmem %s1062_s25, 256  ;;  %p1064_p5 = scmp.lt.s32.totalorder %s1426_s29, %s1062_s25 }
  0x79   : > { %721 = vmatmul.mubr.msk.f32.vlgmr.msra.gmra.mrb[0].mxu0 %vm290_vm0, %v1394_v22  ;;  %873 = vmatprep.subr.bf16.mxu1 %v1169_v1  ;;  %v883_v46 = vpack.c.bf16 %v391_v43, %v390_v42  ;;  %v856_v47 = vpack.c.bf16 %v405_v45, %v404_v44  ;;  %v407_v49 = vld [vmem:[#allocation8 + $0xd8] sm:$0xff]  ;;  %v408_v51 = vld [vmem:[#allocation8 + $0xe0] sm:$0xff]  ;;  %v409_v52 = vld [vmem:[#allocation8 + $0xe8] sm:$0xff]  ;;  %p1060_p3 = pneg %p1059_p1  ;;  %p1065_p9 = scmp.lt.s32.totalorder %s1063_s27, %s1057_s14 }
  0x7a   : > { %845 = vmatpush3.bf16.msra.mxu0 %v844_v23  ;;  %v859_v50 = vpack.c.bf16 %v407_v49, %v406_v48  ;;  %v392_v53 = vld [vmem:[#allocation8 + $0x60] sm:$0xff]  ;;  %v862_v54 = vpack.c.bf16 %v409_v52, %v408_v51  ;;  %v393_v55 = vld [vmem:[#allocation8 + $0x68] sm:$0xff]  ;;  %v410_v57 = vld [vmem:[#allocation8 + $0xf0] sm:$0xff]  ;;  %797 = vmatprep.mubr.msk.f32.mxu0 %vm1170_vm1, %v1168_v0 }
  0x7b   : > { %846 = vmatprep.subr.bf16.mxu0 %v1169_v1  ;;  %v886_v56 = vpack.c.bf16 %v393_v55, %v392_v53  ;;  %v411_v58 = vld [vmem:[#allocation8 + $0xf8] sm:$0xff]  ;;  %v394_v59 = vld [vmem:[#allocation8 + $0x70] sm:$0xff]  ;;  %p1066_p12 = por %p1065_p9, %p1064_p5 }
  0x7c   : > { %875 = vmatpush3.bf16.msra.mxu1 %v874_v28  ;;  %v865_v60 = vpack.c.bf16 %v411_v58, %v410_v57  ;;  %v395_v61 = vld [vmem:[#allocation8 + $0x78] sm:$0xff] }
  0x7d   : > { %876 = vmatprep.subr.bf16.mxu1 %v1169_v1  ;;  %v889_v62 = vpack.c.bf16 %v395_v61, %v394_v59  ;;  %p1067_p2 = pnand %p1066_p12, %p1060_p3 }
  0x7e   : > { %848 = vmatpush3.bf16.msra.mxu0 %v847_v29 }
  0x7f   : > { %849 = vmatprep.subr.bf16.mxu0 %v1169_v1 }
  0x80   : > { %878 = vmatpush3.bf16.msra.mxu1 %v877_v34 }
  0x81   : > { %879 = vmatprep.subr.bf16.mxu1 %v1169_v1 }
  0x82   : > { %851 = vmatpush3.bf16.msra.mxu0 %v850_v35 }
  0x83   : > { %852 = vmatprep.subr.bf16.mxu0 %v1169_v1 }
  0x84   : > { %881 = vmatpush3.bf16.msra.mxu1 %v880_v40 }
  0x85   : > { %882 = vmatprep.subr.bf16.mxu1 %v1169_v1 }
  0x86   : > { %854 = vmatpush3.bf16.msra.mxu0 %v853_v41 }
  0x87   : > { %855 = vmatprep.subr.bf16.mxu0 %v1169_v1 }
  0x88   : > { %884 = vmatpush3.bf16.msra.mxu1 %v883_v46 }
  0x89   : > { %885 = vmatprep.subr.bf16.mxu1 %v1169_v1 }
  0x8a   : > { %857 = vmatpush3.bf16.msra.mxu0 %v856_v47 }
  0x8b   : > { %858 = vmatprep.subr.bf16.mxu0 %v1169_v1 }
  0x8c   : > { %887 = vmatpush3.bf16.msra.mxu1 %v886_v56 }
  0x8d   : > { %888 = vmatprep.subr.bf16.mxu1 %v1169_v1 }
  0x8e   : > { %860 = vmatpush3.bf16.msra.mxu0 %v859_v50 }
  0x8f   : > { %861 = vmatprep.subr.bf16.mxu0 %v1169_v1 }
  0x90   : > { %890 = vmatpush3.bf16.msra.mxu1 %v889_v62 }
  0x92   : > { %863 = vmatpush3.bf16.msra.mxu0 %v862_v54 }
  0x93   : > { %864 = vmatprep.subr.bf16.mxu0 %v1169_v1 }
  0x96   : > { %866 = vmatpush3.bf16.msra.mxu0 %v865_v60 }
 0x14c   : > { %v360_v4 = vpop.f32.mrb[0].mxu0 }
 0x14d   : > { %v365_v1 = vmul.f32 %v360_v4, %v360_v4  ;;  %v362_v6 = vpop.f32.mrb[1].mxu0 }
 0x14e   : > { %v366_v7 = vmul.f32 %v362_v6, %v362_v6 }
 0x150   : > { %v367_v9 = vadd.f32 %v366_v7, %v365_v1 }
 0x152   : > { %vm376_vm3 = vcmp.gt.f32.partialorder %v367_v9, %v375_v8 }
 0x153   : > { %vm377_vm4 = vmand %vm373_vm2, %vm376_vm3 }
 0x154   : > { %798 = vmatmul.mubr.msk.f32.vlgmr.msra.gmra.mrb[2].mxu0 %vm377_vm4, %v362_v6  ;;  %833 = vmatmul.mubr.msk.f32.vlgmr.msra.gmra.mrb[0].mxu1 %vm377_vm4, %v360_v4 }
 0x227   : > { %v478_v0 = vpop.f32.mrb[2].mxu0  ;;  %v548_v10 = vpop.f32.mrb[0].mxu1 }
 0x228   : > { %v549_v11 = vadd.f32 %v548_v10, %v478_v0  ;;  %v799_v12 = vpop.f32.mrb[3].mxu0  ;;  %v834_v13 = vpop.f32.mrb[1].mxu1 }
 0x22a   : > { %v553_v14 = vsub.f32 %v1394_v22, %v549_v11  ;;  %552 = vst.msk [vmem:[%s273_s11] sm:$0xff] %vm290_vm0, %v549_v11 }
 0x22b   : > { %1070 = shalt.err (!%p1067_p2)
}
 0x22c   : > { %s1071_s9 = scalar_lea.hbm %s1424_s30, 128  ;;  %s1075_s28 = scalar_lea.hbm %s1506_s4, 256 }
 0x22d   : > { %p1072_p13 = scmp.ne.s32.totalorder %s1424_s30, %s1071_s9  ;;  %p1076_p4 = scmp.lt.u32.totalorder %s1424_s30, %s1506_s4 }
 0x22e   : > { %p1077_p7 = scmp.lt.u32.totalorder %s1075_s28, %s1071_s9  ;;  %p1079_p11 = scmp.lt.u32.totalorder %s1071_s9, %s1424_s30 }
 0x22f   : > { %p1073_p6 = pnand %p1072_p13, %p1521_p0 }
 0x230   : > { %p1078_p8 = por %p1077_p7, %p1076_p4 }
 0x231   : > { %p1074_p10 = pneg %p1073_p6 }
 0x232   : > { %p1080_p1 = por %p1079_p11, %p1078_p8 }
 0x234   : > { %p1081_p3 = pnand %p1080_p1, %p1074_p10 }
 0x236   : > { %1084 = shalt.err (!%p1081_p3)
}
 0x237   : > { %902 = dma.vmem_to_hbm [thread:$0]  (%p1521_p0), %s1426_s29, 128, %s1424_s30, %s556_s8   ;;  %554 = vst.msk [vmem:[%s280_s12] sm:$0xff] %vm290_vm0, %v553_v14 }
 0x238   : > { %s561_s14 = scalar_lea.sflag [#allocation11], %s1375_s10  ;;  %s1085_s15 = scalar_lea.vmem %s1435_s17, 128 }
 0x239   : > { %p1086_p5 = scmp.ne.s32.totalorder %s1435_s17, %s1085_s15  ;;  %s1172_s25 = smov [#allocation10]  }
 0x23a   : > { %s1089_s27 = sshll.u32 %s1172_s25, 4  ;;  %s1090_s27 = int_to_ptr.vmem [resolvable:$false] %s1089_s27 }
 0x23b   : > { %p1087_p9 = pnand %p1086_p5, %p1521_p0  ;;  %s1091_s9 = scalar_lea.vmem %s1090_s27, 256 }
 0x23c   : > { %p1092_p2 = scmp.lt.s32.totalorder %s1435_s17, %s1090_s27  ;;  %p1093_p13 = scmp.lt.s32.totalorder %s1091_s9, %s1085_s15 }
 0x23d   : > { %p1088_p12 = pneg %p1087_p9 }
 0x23e   : > { %p1094_p6 = por %p1093_p13, %p1092_p2 }
 0x240   : > { %p1095_p10 = pnand %p1094_p6, %p1088_p12 }
 0x242   : > { %1098 = shalt.err (!%p1095_p10)
}
 0x243   : > { %s1099_s10 = scalar_lea.hbm %s1433_s6, 128  ;;  %s1103_s12 = scalar_lea.hbm %s1507_s5, 256 }
 0x244   : > { %p1100_p4 = scmp.ne.s32.totalorder %s1433_s6, %s1099_s10  ;;  %p1104_p11 = scmp.lt.u32.totalorder %s1433_s6, %s1507_s5 }
 0x245   : > { %p1105_p1 = scmp.lt.u32.totalorder %s1103_s12, %s1099_s10  ;;  %p1107_p5 = scmp.lt.u32.totalorder %s1099_s10, %s1433_s6 }
 0x246   : > { %p1101_p7 = pnand %p1100_p4, %p1521_p0 }
 0x247   : > { %p1106_p3 = por %p1105_p1, %p1104_p11 }
 0x248   : > { %p1102_p8 = pneg %p1101_p7 }
 0x249   : > { %p1108_p9 = por %p1107_p5, %p1106_p3 }
 0x24b   : > { %p1109_p12 = pnand %p1108_p9, %p1102_p8 }
 0x24d   : > { %1112 = shalt.err (!%p1109_p12)
}
 0x24e   : > { %903 = dma.vmem_to_hbm [thread:$0]  (%p1521_p0), %s1435_s17, 128, %s1433_s6, %s561_s14  }
 0x24f PF: > { %s599_s11 = sand.u32 1, %s1147_s20   ;;  %p1522_p2 = scmp.ne.s32.totalorder %s1512_s26, 0 }
 0x250   : > { %p1523_p13 = scmp.ge.s32.totalorder %s1159_s23, 2  ;;  %s600_s18 = scalar_lea.sflag [#allocation5], %s599_s11 }
 0x252   : > { %p918_p6 = pnand %p1523_p13, %p1522_p2 }
 0x254   : > { %1138 = dma.done.wait (!%p918_p6), %s600_s18, 128  }
 0x255   : > { %1140 = vsyncadd (!%p918_p6), %s600_s18, 4294967168  ;;  %s609_s28 = scalar_lea.sflag [#allocation11], %s599_s11 }
 0x256   : > { %1142 = dma.done.wait (!%p918_p6), %s609_s28, 128  }
 0x257   : > { %1144 = vsyncadd (!%p918_p6), %s609_s28, 4294967168  ;;  %p24_p0 = scmp.ge.s32.totalorder %s1316_s16, 4   ;;  %s1524_s20 = smov %s1151_s21 }
 0x258   : > { %s1525_s21 = smov %s1155_s22  ;;  %s1526_s22 = smov %s1325_s19 }
 0x259   : > { %s1527_s23 = smov %s1316_s16  ;;  %26 = sbr.rel (!%p24_p0) target bundleno = 10 (0xa), region = 106 }
 0x260   :  { %614 = vsyncpa [#allocation4], 1 }
 0x261   :  { %616 = vsyncpa [#allocation4 + $0x1], 1 }
 0x262   :  { %617 = vsyncpa [#allocation7], 1 }
 0x263   :  { %618 = vsyncpa [#allocation5], 1 }
 0x264   :  { %620 = vsyncpa [#allocation5 + $0x1], 1 }
 0x265   :  { %621 = vsyncpa [#allocation11], 1 }
 0x266   :  { %623 = vsyncpa [#allocation11 + $0x1], 1 }

</bundles_post_ra>
